<compile_context>
chip_gen: v5e
topology: v5e:2x2
jax: 0.10.0
libtpu: 0.0.40
codegen_flags: <defaults>
</compile_context>

<pallas_src>
import functools

import jax
import jax.numpy as jnp
from jax.experimental import pallas as pl
from jax.experimental.pallas import tpu as pltpu

_LANE = 128


def _round_up(n: int, m: int) -> int:
    return ((n + m - 1) // m) * m


def mlp_kernel(x_ref, w1_ref, b1_ref, w2_ref, b2_ref, w3_ref, b3_ref, o_ref):
    cd = w1_ref.dtype                      # compute dtype = weight dtype
    x = x_ref[...].astype(cd)

    # layer 1: Linear + ReLU (f32 MXU accumulation, f32 bias add / ReLU)
    h1 = jnp.dot(x, w1_ref[...], preferred_element_type=jnp.float32) + b1_ref[...]
    h1 = jnp.maximum(h1, 0.0).astype(cd)

    # layer 2: Linear + ReLU
    h2 = jnp.dot(h1, w2_ref[...], preferred_element_type=jnp.float32) + b2_ref[...]
    h2 = jnp.maximum(h2, 0.0).astype(cd)

    # layer 3: Linear (no activation); only the first out_dim lanes are real
    # logits (the rest are zero-weight / zero-bias padding) -> slice before the
    # store so only out_dim columns are written back to HBM.
    out = jnp.dot(h2, w3_ref[...], preferred_element_type=jnp.float32) + b3_ref[...]
    o_ref[...] = out[:, : o_ref.shape[-1]].astype(o_ref.dtype)


def prepare_params(w1, b1, w2, b2, w3, b3, param_dtype=jnp.float32):
    """Pad / cast / layout the Linear params ONCE (outside the jitted forward).

    w_i: [fan_in, fan_out]  (transpose of torch nn.Linear.weight)
    b_i: [fan_out]
    Hidden and output feature dims are zero-padded to multiples of 128 lanes
    (zero weights + zero bias keep the math exact); biases stay f32.
    """
    f_in, hid1 = w1.shape
    _, hid2 = w2.shape
    _, f_out = w3.shape
    h1_p = _round_up(hid1, _LANE)
    h2_p = _round_up(hid2, _LANE)
    f_out_p = _round_up(f_out, _LANE)
    pd = param_dtype

    w1p = jnp.zeros((f_in, h1_p), pd).at[:, :hid1].set(w1.astype(pd))
    w2p = jnp.zeros((h1_p, h2_p), pd).at[:hid1, :hid2].set(w2.astype(pd))
    w3p = jnp.zeros((h2_p, f_out_p), pd).at[:hid2, :f_out].set(w3.astype(pd))
    b1p = jnp.zeros((1, h1_p), jnp.float32).at[0, :hid1].set(
        b1.astype(jnp.float32).reshape(-1))
    b2p = jnp.zeros((1, h2_p), jnp.float32).at[0, :hid2].set(
        b2.astype(jnp.float32).reshape(-1))
    b3p = jnp.zeros((1, f_out_p), jnp.float32).at[0, :f_out].set(
        b3.astype(jnp.float32).reshape(-1))
    return w1p, b1p, w2p, b2p, w3p, b3p


@functools.partial(jax.jit, static_argnames=("out_dim", "block_b"))
def mlp_forward(x, params, *, out_dim, block_b=None):
    """x: [B, f_in] (f32 or bf16); params from prepare_params(). Returns [B, out_dim] f32."""
    w1p, b1p, w2p, b2p, w3p, b3p = params
    B, f_in = x.shape
    if w1p.shape[0] != f_in:
        raise ValueError(f"x feature dim {f_in} != w1 fan_in {w1p.shape[0]}")
    h1_p = w1p.shape[1]
    h2_p = w2p.shape[1]
    f_out_p = w3p.shape[1]

    bf16_stream = x.dtype == jnp.bfloat16
    sub = 16 if bf16_stream else 8          # sublane packing of the x tile
    if block_b is None:
        block_b = 2048 if bf16_stream else 1024

    # Batch tile: large enough to amortize the ~0.35us per-grid-step cost
    # (kernel is HBM-bound), rounded to the sublane multiple, and split into
    # >=2 tiles whenever possible so both v7x TensorCores get work.
    tb = _round_up(min(block_b, B), sub)
    if B <= tb and tb >= 2 * sub:
        tb = _round_up((tb + 1) // 2, sub)
    B_p = _round_up(B, tb)
    grid = (B_p // tb,)

    # Only the batch dim is (cheaply) padded when needed; features stay unpadded.
    xp = x if B_p == B else jnp.pad(x, ((0, B_p - B), (0, 0)))

    # Explicit VMEM budget: resident params + double-buffered streamed tiles.
    param_bytes = sum(int(p.size) * p.dtype.itemsize
                      for p in (w1p, b1p, w2p, b2p, w3p, b3p))
    stream_bytes = tb * f_in * x.dtype.itemsize + tb * out_dim * 4
    vmem_est = 2 * (stream_bytes + param_bytes) + (2 << 20)
    vmem_limit = int(min(max(vmem_est, 32 << 20), 64 << 20))

    out_p = pl.pallas_call(
        mlp_kernel,
        out_shape=jax.ShapeDtypeStruct((B_p, out_dim), jnp.float32),
        grid=grid,
        in_specs=[
            # x: streamed over the batch grid, UNPADDED feature dim
            # (full-array last dim is a legal block dim even if % 128 != 0).
            pl.BlockSpec((tb, f_in), lambda i: (i, 0)),
            # weights / biases: constant index_map -> VMEM-resident across grid.
            pl.BlockSpec((f_in, h1_p), lambda i: (0, 0)),
            pl.BlockSpec((1, h1_p), lambda i: (0, 0)),
            pl.BlockSpec((h1_p, h2_p), lambda i: (0, 0)),
            pl.BlockSpec((1, h2_p), lambda i: (0, 0)),
            pl.BlockSpec((h2_p, f_out_p), lambda i: (0, 0)),
            pl.BlockSpec((1, f_out_p), lambda i: (0, 0)),
        ],
        # Narrow (B_p, out_dim) output: 64x less HBM writeback than a 128-lane
        # padded output; the store is masked but the data volume is tiny.
        out_specs=pl.BlockSpec((tb, out_dim), lambda i: (i, 0)),
        compiler_params=pltpu.CompilerParams(
            dimension_semantics=("parallel",),   # batch tiles independent (v7x 2 TCs)
            vmem_limit_bytes=vmem_limit,
        ),
    )(xp, w1p, b1p, w2p, b2p, w3p, b3p)

    return out_p if B_p == B else out_p[:B]


def init_linear_params(key, fan_in, fan_out):
    """Mimics PyTorch nn.Linear default init (uniform +/- 1/sqrt(fan_in)).
    Weight is returned as [fan_in, fan_out] (already transposed for x @ W)."""
    kw, kb = jax.random.split(key)
    bound = 1.0 / jnp.sqrt(jnp.float32(fan_in))
    w = jax.random.uniform(kw, (fan_in, fan_out), jnp.float32, -bound, bound)
    b = jax.random.uniform(kb, (fan_out,), jnp.float32, -bound, bound)
    return w, b


def reference_forward(x, w1, b1, w2, b2, w3, b3, compute_dtype=jnp.float32):
    c = lambda a: a.astype(compute_dtype)
    hp = jax.lax.Precision.HIGHEST
    h1 = jnp.dot(c(x), c(w1), precision=hp,
                 preferred_element_type=jnp.float32) + b1.reshape(1, -1)
    h1 = jnp.maximum(h1, 0.0)
    h2 = jnp.dot(c(h1), c(w2), precision=hp,
                 preferred_element_type=jnp.float32) + b2.reshape(1, -1)
    h2 = jnp.maximum(h2, 0.0)
    return jnp.dot(c(h2), c(w3), precision=hp,
                   preferred_element_type=jnp.float32) + b3.reshape(1, -1)


if __name__ == "__main__":
    # Shapes from the PyTorch module globals: input=1000, hidden=100, output=2.
    batch, in_dim, hid_dim, out_dim = 8, 1000, 100, 2

    key = jax.random.PRNGKey(0)
    kx, k1, k2, k3 = jax.random.split(key, 4)

    x = jax.random.normal(kx, (batch, in_dim), jnp.float32)
    w1, b1 = init_linear_params(k1, in_dim, hid_dim)
    w2, b2 = init_linear_params(k2, hid_dim, hid_dim)
    w3, b3 = init_linear_params(k3, hid_dim, out_dim)

    # ---- f32 path: padded/cast params prepared once, outside the jitted forward ----
    params_f32 = prepare_params(w1, b1, w2, b2, w3, b3, param_dtype=jnp.float32)
    out = jax.block_until_ready(mlp_forward(x, params_f32, out_dim=out_dim))
    ref = reference_forward(x, w1, b1, w2, b2, w3, b3)
    assert out.shape == (batch, out_dim), out.shape
    assert jnp.allclose(out, ref, atol=1e-3, rtol=1e-3), float(jnp.max(jnp.abs(out - ref)))

    # ---- bf16 path: bf16 resident weights + bf16-streamed x, f32 MXU accumulation ----
    params_bf16 = prepare_params(w1, b1, w2, b2, w3, b3, param_dtype=jnp.bfloat16)
    x_bf16 = x.astype(jnp.bfloat16)            # caller keeps activations in bf16
    out_bf16 = jax.block_until_ready(mlp_forward(x_bf16, params_bf16, out_dim=out_dim))
    ref_bf16 = reference_forward(x_bf16, w1, b1, w2, b2, w3, b3,
                                 compute_dtype=jnp.bfloat16)
    assert out_bf16.shape == (batch, out_dim), out_bf16.shape
    assert jnp.allclose(out_bf16, ref_bf16, atol=5e-2, rtol=5e-2), float(
        jnp.max(jnp.abs(out_bf16 - ref_bf16)))

    print("KERNEL_OK")
</pallas_src>

<mosaic_0001>
module attributes {stable_mosaic.version = 11 : i64} {
  func.func @mlp_kernel(%arg0: i32, %arg1: memref<8x1000xf32, #tpu.memory_space<vmem>>, %arg2: memref<1000x128xf32, #tpu.memory_space<vmem>>, %arg3: memref<1x128xf32, #tpu.memory_space<vmem>>, %arg4: memref<128x128xf32, #tpu.memory_space<vmem>>, %arg5: memref<1x128xf32, #tpu.memory_space<vmem>>, %arg6: memref<128x128xf32, #tpu.memory_space<vmem>>, %arg7: memref<1x128xf32, #tpu.memory_space<vmem>>, %arg8: memref<8x2xf32, #tpu.memory_space<vmem>>) attributes {dimension_semantics = [#tpu.dimension_semantics<parallel>], iteration_bounds = array<i64: 1>, scalar_prefetch = 0 : i64, scratch_operands = 0 : i64, tpu.core_type = #tpu.core_type<tc>, window_params = [{transform_indices = @transform_0, window_bounds = array<i64: 8, 1000>}, {pipeline_mode = #tpu.pipeline_mode<synchronous>, transform_indices = @transform_1, window_bounds = array<i64: 1000, 128>}, {pipeline_mode = #tpu.pipeline_mode<synchronous>, transform_indices = @transform_2, window_bounds = array<i64: 1, 128>}, {pipeline_mode = #tpu.pipeline_mode<synchronous>, transform_indices = @transform_3, window_bounds = array<i64: 128, 128>}, {pipeline_mode = #tpu.pipeline_mode<synchronous>, transform_indices = @transform_4, window_bounds = array<i64: 1, 128>}, {pipeline_mode = #tpu.pipeline_mode<synchronous>, transform_indices = @transform_5, window_bounds = array<i64: 128, 128>}, {pipeline_mode = #tpu.pipeline_mode<synchronous>, transform_indices = @transform_6, window_bounds = array<i64: 1, 128>}, {transform_indices = @transform_7, window_bounds = array<i64: 8, 2>}]} {
    %c0 = arith.constant 0 : index
    %c0_0 = arith.constant 0 : index
    %0 = vector.load %arg1[%c0, %c0_0] : memref<8x1000xf32, #tpu.memory_space<vmem>>, vector<8x1000xf32>
    %c0_1 = arith.constant 0 : index
    %c0_2 = arith.constant 0 : index
    %1 = vector.load %arg2[%c0_1, %c0_2] : memref<1000x128xf32, #tpu.memory_space<vmem>>, vector<1000x128xf32>
    %cst = arith.constant dense<0.000000e+00> : vector<8x128xf32>
    %2 = tpu.matmul %0, %1, %cst {dimension_numbers = #tpu.dot_dimension_numbers<[1], [0], [0], [1], [0, 0, 1, 1], [], []>} : vector<8x1000xf32>, vector<1000x128xf32>, vector<8x128xf32> -> vector<8x128xf32>
    %c0_3 = arith.constant 0 : index
    %c0_4 = arith.constant 0 : index
    %3 = vector.load %arg3[%c0_3, %c0_4] : memref<1x128xf32, #tpu.memory_space<vmem>>, vector<1x128xf32>
    %4 = vector.broadcast %3 : vector<1x128xf32> to vector<8x128xf32>
    %5 = arith.addf %2, %4 : vector<8x128xf32>
    %cst_5 = arith.constant 0.000000e+00 : f32
    %6 = vector.broadcast %cst_5 : f32 to vector<8x128xf32>
    %7 = arith.maximumf %5, %6 : vector<8x128xf32>
    %c0_6 = arith.constant 0 : index
    %c0_7 = arith.constant 0 : index
    %8 = vector.load %arg4[%c0_6, %c0_7] : memref<128x128xf32, #tpu.memory_space<vmem>>, vector<128x128xf32>
    %cst_8 = arith.constant dense<0.000000e+00> : vector<8x128xf32>
    %9 = tpu.matmul %7, %8, %cst_8 {dimension_numbers = #tpu.dot_dimension_numbers<[1], [0], [0], [1], [0, 0, 1, 1], [], []>} : vector<8x128xf32>, vector<128x128xf32>, vector<8x128xf32> -> vector<8x128xf32>
    %c0_9 = arith.constant 0 : index
    %c0_10 = arith.constant 0 : index
    %10 = vector.load %arg5[%c0_9, %c0_10] : memref<1x128xf32, #tpu.memory_space<vmem>>, vector<1x128xf32>
    %11 = vector.broadcast %10 : vector<1x128xf32> to vector<8x128xf32>
    %12 = arith.addf %9, %11 : vector<8x128xf32>
    %cst_11 = arith.constant 0.000000e+00 : f32
    %13 = vector.broadcast %cst_11 : f32 to vector<8x128xf32>
    %14 = arith.maximumf %12, %13 : vector<8x128xf32>
    %c0_12 = arith.constant 0 : index
    %c0_13 = arith.constant 0 : index
    %15 = vector.load %arg6[%c0_12, %c0_13] : memref<128x128xf32, #tpu.memory_space<vmem>>, vector<128x128xf32>
    %cst_14 = arith.constant dense<0.000000e+00> : vector<8x128xf32>
    %16 = tpu.matmul %14, %15, %cst_14 {dimension_numbers = #tpu.dot_dimension_numbers<[1], [0], [0], [1], [0, 0, 1, 1], [], []>} : vector<8x128xf32>, vector<128x128xf32>, vector<8x128xf32> -> vector<8x128xf32>
    %c0_15 = arith.constant 0 : index
    %c0_16 = arith.constant 0 : index
    %17 = vector.load %arg7[%c0_15, %c0_16] : memref<1x128xf32, #tpu.memory_space<vmem>>, vector<1x128xf32>
    %18 = vector.broadcast %17 : vector<1x128xf32> to vector<8x128xf32>
    %19 = arith.addf %16, %18 : vector<8x128xf32>
    %20 = vector.extract_strided_slice %19 {offsets = [0, 0], sizes = [8, 2], strides = [1, 1]} : vector<8x128xf32> to vector<8x2xf32>
    %c0_17 = arith.constant 0 : index
    %c0_18 = arith.constant 0 : index
    %21 = vector.load %arg8[%c0_17, %c0_18] : memref<8x2xf32, #tpu.memory_space<vmem>>, vector<8x2xf32>
    tpu.vector_store %arg8[%c0_17, %c0_18], %20 {strides = array<i32>} : memref<8x2xf32, #tpu.memory_space<vmem>>, vector<8x2xf32>,
    return
  }
  func.func @transform_0(%arg0: i32) -> (i32, i32) {
    %c0_i32 = arith.constant 0 : i32
    %c0_i32_0 = arith.constant 0 : i32
    return %arg0, %c0_i32 : i32, i32
  }
  func.func @transform_1(%arg0: i32) -> (i32, i32) {
    %c0_i32 = arith.constant 0 : i32
    %c0_i32_0 = arith.constant 0 : i32
    %c0_i32_1 = arith.constant 0 : i32
    return %c0_i32, %c0_i32_0 : i32, i32
  }
  func.func @transform_2(%arg0: i32) -> (i32, i32) {
    %c0_i32 = arith.constant 0 : i32
    %c0_i32_0 = arith.constant 0 : i32
    %c0_i32_1 = arith.constant 0 : i32
    return %c0_i32, %c0_i32_0 : i32, i32
  }
  func.func @transform_3(%arg0: i32) -> (i32, i32) {
    %c0_i32 = arith.constant 0 : i32
    %c0_i32_0 = arith.constant 0 : i32
    %c0_i32_1 = arith.constant 0 : i32
    return %c0_i32, %c0_i32_0 : i32, i32
  }
  func.func @transform_4(%arg0: i32) -> (i32, i32) {
    %c0_i32 = arith.constant 0 : i32
    %c0_i32_0 = arith.constant 0 : i32
    %c0_i32_1 = arith.constant 0 : i32
    return %c0_i32, %c0_i32_0 : i32, i32
  }
  func.func @transform_5(%arg0: i32) -> (i32, i32) {
    %c0_i32 = arith.constant 0 : i32
    %c0_i32_0 = arith.constant 0 : i32
    %c0_i32_1 = arith.constant 0 : i32
    return %c0_i32, %c0_i32_0 : i32, i32
  }
  func.func @transform_6(%arg0: i32) -> (i32, i32) {
    %c0_i32 = arith.constant 0 : i32
    %c0_i32_0 = arith.constant 0 : i32
    %c0_i32_1 = arith.constant 0 : i32
    return %c0_i32, %c0_i32_0 : i32, i32
  }
  func.func @transform_7(%arg0: i32) -> (i32, i32) {
    %c0_i32 = arith.constant 0 : i32
    %c0_i32_0 = arith.constant 0 : i32
    return %arg0, %c0_i32 : i32, i32
  }
}

</mosaic_0001>

<bundles_post_ra>
// kernel: mlp_forward.1
= control target key start
LH: loop header
LB: loop body
LE: loop exit
PB: predicated region body
PF: predicated region fallthrough
CT: control target
= control target key end

     0   :  { %12 = vsyncpa [#allocation3], 0  ;;  %s661_s0 = inlined_call_operand.hbm [shape: f32[8,1000], index: 0, kind: input, shape index: {}]   ;;  %s662_s1 = inlined_call_operand.hbm [shape: f32[1000,128], index: 1, kind: input, shape index: {}]   ;;  %s663_s2 = inlined_call_operand.vmem [shape: f32[1,128], index: 2, kind: input, shape index: {}]   ;;  %s664_s3 = inlined_call_operand.hbm [shape: f32[128,128], index: 3, kind: input, shape index: {}]   ;;  %s665_s4 = inlined_call_operand.vmem [shape: f32[1,128], index: 4, kind: input, shape index: {}]   ;;  %s666_s5 = inlined_call_operand.hbm [shape: f32[128,128], index: 5, kind: input, shape index: {}]   ;;  %s667_s6 = inlined_call_operand.vmem [shape: f32[1,128], index: 6, kind: input, shape index: {}]   ;;  %s668_s7 = inlined_call_operand.vmem [shape: f32[8,2], index: 7, kind: output, shape index: {}]  }
   0x1   :  { %13 = vsyncpa [#allocation5], 0  ;;  %s30_s26 = sshll.u32 %s662_s1, 4  ;;  %s31_s26 = int_to_ptr.hbm [resolvable:$true] %s30_s26 }
   0x2   :  { %14 = vsyncpa [#allocation8], 0  ;;  %s591_s27 = smov [#allocation4]   ;;  %s20_s8 = sshll.u32 %s661_s0, 4  ;;  %s21_s8 = int_to_ptr.hbm [resolvable:$true] %s20_s8 }
   0x3   :  { %s32_s28 = sshll.u32 %s591_s27, 4  ;;  %s592_s9 = smov 128   ;;  %s33_s28 = int_to_ptr.vmem [resolvable:$true] %s32_s28 }
   0x4   :  { %s593_s10 = smov 8   ;;  %s594_s11 = smov [#allocation2]  }
   0x5   :  { %38 = dma.hbm_to_vmem [thread:$0]  %s31_s26, 16000, %s33_s28, [#allocation5], %s592_s9, %s592_s9, %s593_s10  }
   0x6   :  { %s22_s12 = sshll.u32 %s594_s11, 4  ;;  %s45_s15 = sshll.u32 %s664_s3, 4  ;;  %s23_s12 = int_to_ptr.vmem [resolvable:$true] %s22_s12  ;;  %s46_s15 = int_to_ptr.hbm [resolvable:$true] %s45_s15 }
   0x7   :  { %25 = dma.hbm_to_vmem [thread:$0]  %s21_s8, 1024, %s23_s12, [#allocation3]  }
   0x8   :  { %s60_s17 = sshll.u32 %s666_s5, 4  ;;  %s595_s18 = smov [#allocation6]   ;;  %s61_s17 = int_to_ptr.hbm [resolvable:$true] %s60_s17 }
   0x9   :  { %s47_s19 = sshll.u32 %s595_s18, 4  ;;  %s596_s0 = smov [#allocation7]   ;;  %s48_s19 = int_to_ptr.vmem [resolvable:$true] %s47_s19 }
   0xa   :  { %53 = dma.hbm_to_vmem [thread:$0]  %s46_s15, 2048, %s48_s19, [#allocation5], %s592_s9, %s592_s9, %s593_s10  }
   0xb   :  { %s62_s20 = sshll.u32 %s596_s0, 4  ;;  %s63_s20 = int_to_ptr.vmem [resolvable:$true] %s62_s20 }
   0xc   :  { %68 = dma.hbm_to_vmem [thread:$0]  %s61_s17, 2048, %s63_s20, [#allocation8], %s592_s9, %s592_s9, %s593_s10  }
   0xd   :  { %585 = dma.done.wait [#allocation3], 1024  }
   0xe   :  { %586 = vsyncadd [#allocation3], 4294966272 }
   0xf   :  { %587 = dma.done.wait [#allocation5], 18048  }
  0x10   :  { %588 = vsyncadd [#allocation5], 4294949248 }
  0x11   :  { %589 = dma.done.wait [#allocation8], 2048  }
  0x12   :  { %590 = vsyncadd [#allocation8], 4294965248  ;;  %v142_v0 = vld [vmem:[#allocation4 + $0x178] sm:$0xff]  ;;  %v141_v2 = vld [vmem:[#allocation4 + $0x170] sm:$0xff]  ;;  %vm224_vm0 = vcmask 850944   ;;  %vm470_vm1 = vcmask 15360  }
  0x13   :  { %v110_v1 = vld [vmem:[#allocation4 + $0x78] sm:$0xff]  ;;  %268 = vmatpush.msra.mxu2 %v142_v0  ;;  %v109_v3 = vld [vmem:[#allocation4 + $0x70] sm:$0xff]  ;;  %v140_v5 = vld [vmem:[#allocation4 + $0x168] sm:$0xff] }
  0x14   :  { %228 = vmatpush.msra.mxu0 %v110_v1  ;;  %v126_v4 = vld [vmem:[#allocation4 + $0xf8] sm:$0xff]  ;;  %v108_v6 = vld [vmem:[#allocation4 + $0x68] sm:$0xff]  ;;  %v125_v7 = vld [vmem:[#allocation4 + $0xf0] sm:$0xff] }
  0x15   :  { %248 = vmatpush.msra.mxu1 %v126_v4  ;;  %269 = vmatpush.msra.mxu2 %v141_v2  ;;  %v124_v8 = vld [vmem:[#allocation4 + $0xe8] sm:$0xff]  ;;  %v139_v9 = vld [vmem:[#allocation4 + $0x160] sm:$0xff]  ;;  %v158_v11 = vld [vmem:[#allocation4 + $0x1f8] sm:$0xff] }
  0x16   :  { %229 = vmatpush.msra.mxu0 %v109_v3  ;;  %v107_v10 = vld [vmem:[#allocation4 + $0x60] sm:$0xff]  ;;  %v157_v13 = vld [vmem:[#allocation4 + $0x1f0] sm:$0xff]  ;;  %v138_v14 = vld [vmem:[#allocation4 + $0x158] sm:$0xff]  ;;  %288 = vmatpush.msra.mxu3 %v158_v11 }
  0x17   :  { %249 = vmatpush.msra.mxu1 %v125_v7  ;;  %270 = vmatpush.msra.mxu2 %v140_v5  ;;  %v123_v12 = vld [vmem:[#allocation4 + $0xe0] sm:$0xff]  ;;  %v106_v15 = vld [vmem:[#allocation4 + $0x58] sm:$0xff]  ;;  %v156_v17 = vld [vmem:[#allocation4 + $0x1e8] sm:$0xff] }
  0x18   :  { %230 = vmatpush.msra.mxu0 %v108_v6  ;;  %v122_v16 = vld [vmem:[#allocation4 + $0xd8] sm:$0xff]  ;;  %v137_v18 = vld [vmem:[#allocation4 + $0x150] sm:$0xff]  ;;  %289 = vmatpush.msra.mxu3 %v157_v13  ;;  %v155_v21 = vld [vmem:[#allocation4 + $0x1e0] sm:$0xff] }
  0x19   :  { %250 = vmatpush.msra.mxu1 %v124_v8  ;;  %271 = vmatpush.msra.mxu2 %v139_v9  ;;  %v105_v19 = vld [vmem:[#allocation4 + $0x50] sm:$0xff]  ;;  %v136_v22 = vld [vmem:[#allocation4 + $0x148] sm:$0xff]  ;;  %v154_v25 = vld [vmem:[#allocation4 + $0x1d8] sm:$0xff] }
  0x1a   :  { %231 = vmatpush.msra.mxu0 %v107_v10  ;;  %v121_v20 = vld [vmem:[#allocation4 + $0xd0] sm:$0xff]  ;;  %290 = vmatpush.msra.mxu3 %v156_v17  ;;  %v104_v23 = vld [vmem:[#allocation4 + $0x48] sm:$0xff]  ;;  %v135_v26 = vld [vmem:[#allocation4 + $0x140] sm:$0xff] }
  0x1b   :  { %251 = vmatpush.msra.mxu1 %v123_v12  ;;  %272 = vmatpush.msra.mxu2 %v138_v14  ;;  %v120_v24 = vld [vmem:[#allocation4 + $0xc8] sm:$0xff]  ;;  %v103_v27 = vld [vmem:[#allocation4 + $0x40] sm:$0xff]  ;;  %v153_v29 = vld [vmem:[#allocation4 + $0x1d0] sm:$0xff] }
  0x1c   :  { %232 = vmatpush.msra.mxu0 %v106_v15  ;;  %291 = vmatpush.msra.mxu3 %v155_v21  ;;  %v119_v28 = vld [vmem:[#allocation4 + $0xc0] sm:$0xff]  ;;  %v134_v30 = vld [vmem:[#allocation4 + $0x138] sm:$0xff]  ;;  %v152_v33 = vld [vmem:[#allocation4 + $0x1c8] sm:$0xff] }
  0x1d   :  { %252 = vmatpush.msra.mxu1 %v122_v16  ;;  %273 = vmatpush.msra.mxu2 %v137_v18  ;;  %v102_v31 = vld [vmem:[#allocation4 + $0x38] sm:$0xff]  ;;  %v133_v34 = vld [vmem:[#allocation4 + $0x130] sm:$0xff]  ;;  %v151_v37 = vld [vmem:[#allocation4 + $0x1c0] sm:$0xff] }
  0x1e   :  { %233 = vmatpush.msra.mxu0 %v105_v19  ;;  %292 = vmatpush.msra.mxu3 %v154_v25  ;;  %v118_v32 = vld [vmem:[#allocation4 + $0xb8] sm:$0xff]  ;;  %v101_v35 = vld [vmem:[#allocation4 + $0x30] sm:$0xff]  ;;  %v132_v38 = vld [vmem:[#allocation4 + $0x128] sm:$0xff] }
  0x1f   :  { %253 = vmatpush.msra.mxu1 %v121_v20  ;;  %274 = vmatpush.msra.mxu2 %v136_v22  ;;  %v117_v36 = vld [vmem:[#allocation4 + $0xb0] sm:$0xff]  ;;  %v100_v39 = vld [vmem:[#allocation4 + $0x28] sm:$0xff]  ;;  %v150_v41 = vld [vmem:[#allocation4 + $0x1b8] sm:$0xff] }
  0x20   :  { %234 = vmatpush.msra.mxu0 %v104_v23  ;;  %293 = vmatpush.msra.mxu3 %v153_v29  ;;  %v116_v40 = vld [vmem:[#allocation4 + $0xa8] sm:$0xff]  ;;  %v131_v42 = vld [vmem:[#allocation4 + $0x120] sm:$0xff]  ;;  %v149_v45 = vld [vmem:[#allocation4 + $0x1b0] sm:$0xff] }
  0x21   :  { %254 = vmatpush.msra.mxu1 %v120_v24  ;;  %275 = vmatpush.msra.mxu2 %v135_v26  ;;  %v99_v43 = vld [vmem:[#allocation4 + $0x20] sm:$0xff]  ;;  %v130_v46 = vld [vmem:[#allocation4 + $0x118] sm:$0xff]  ;;  %v148_v49 = vld [vmem:[#allocation4 + $0x1a8] sm:$0xff] }
  0x22   :  { %235 = vmatpush.msra.mxu0 %v103_v27  ;;  %294 = vmatpush.msra.mxu3 %v152_v33  ;;  %v115_v44 = vld [vmem:[#allocation4 + $0xa0] sm:$0xff]  ;;  %v98_v47 = vld [vmem:[#allocation4 + $0x18] sm:$0xff]  ;;  %v129_v50 = vld [vmem:[#allocation4 + $0x110] sm:$0xff] }
  0x23   :  { %255 = vmatpush.msra.mxu1 %v119_v28  ;;  %276 = vmatpush.msra.mxu2 %v134_v30  ;;  %v114_v48 = vld [vmem:[#allocation4 + $0x98] sm:$0xff]  ;;  %v97_v51 = vld [vmem:[#allocation4 + $0x10] sm:$0xff]  ;;  %v147_v53 = vld [vmem:[#allocation4 + $0x1a0] sm:$0xff] }
  0x24   :  { %236 = vmatpush.msra.mxu0 %v102_v31  ;;  %295 = vmatpush.msra.mxu3 %v151_v37  ;;  %v113_v52 = vld [vmem:[#allocation4 + $0x90] sm:$0xff]  ;;  %v128_v54 = vld [vmem:[#allocation4 + $0x108] sm:$0xff]  ;;  %v146_v57 = vld [vmem:[#allocation4 + $0x198] sm:$0xff] }
  0x25   :  { %256 = vmatpush.msra.mxu1 %v118_v32  ;;  %277 = vmatpush.msra.mxu2 %v133_v34  ;;  %v96_v55 = vld [vmem:[#allocation4 + $0x8] sm:$0xff]  ;;  %v127_v58 = vld [vmem:[#allocation4 + $0x100] sm:$0xff]  ;;  %v206_v60 = vld [vmem:[#allocation4 + $0x378] sm:$0xff] }
  0x26   :  { %237 = vmatpush.msra.mxu0 %v101_v35  ;;  %296 = vmatpush.msra.mxu3 %v150_v41  ;;  %v112_v56 = vld [vmem:[#allocation4 + $0x88] sm:$0xff]  ;;  %v95_v59 = vld [vmem:[#allocation4] sm:$0xff]  ;;  %v174_v61 = vld [vmem:[#allocation4 + $0x278] sm:$0xff] }
  0x27   :  { %257 = vmatpush.msra.mxu1 %v117_v36  ;;  %278 = vmatpush.msra.mxu2 %v132_v38  ;;  %v111_v62 = vld [vmem:[#allocation4 + $0x80] sm:$0xff]  ;;  %v145_v63 = vld [vmem:[#allocation4 + $0x190] sm:$0xff]  ;;  %v190_v2 = vld [vmem:[#allocation4 + $0x2f8] sm:$0xff] }
  0x28   :  { %238 = vmatpush.msra.mxu0 %v100_v39  ;;  %297 = vmatpush.msra.mxu3 %v149_v45  ;;  %v205_v0 = vld [vmem:[#allocation4 + $0x370] sm:$0xff]  ;;  %v144_v3 = vld [vmem:[#allocation4 + $0x188] sm:$0xff]  ;;  %v143_v7 = vld [vmem:[#allocation4 + $0x180] sm:$0xff] }
  0x29   :  { %258 = vmatpush.msra.mxu1 %v116_v40  ;;  %279 = vmatpush.msra.mxu2 %v131_v42  ;;  %v173_v1 = vld [vmem:[#allocation4 + $0x270] sm:$0xff]  ;;  %v204_v4 = vld [vmem:[#allocation4 + $0x368] sm:$0xff]  ;;  %v203_v8 = vld [vmem:[#allocation4 + $0x360] sm:$0xff] }
  0x2a   :  { %239 = vmatpush.msra.mxu0 %v99_v43  ;;  %298 = vmatpush.msra.mxu3 %v148_v49  ;;  %v172_v5 = vld [vmem:[#allocation4 + $0x268] sm:$0xff]  ;;  %v189_v6 = vld [vmem:[#allocation4 + $0x2f0] sm:$0xff]  ;;  %v171_v9 = vld [vmem:[#allocation4 + $0x260] sm:$0xff] }
  0x2b   :  { %259 = vmatpush.msra.mxu1 %v115_v44  ;;  %280 = vmatpush.msra.mxu2 %v130_v46  ;;  %v188_v10 = vld [vmem:[#allocation4 + $0x2e8] sm:$0xff]  ;;  %v219_v11 = vld [vmem:[#allocation4 + $0x3e0] sm:$0xff]  ;;  %v202_v12 = vld [vmem:[#allocation4 + $0x358] sm:$0xff] }
  0x2c   :  { %240 = vmatpush.msra.mxu0 %v98_v47  ;;  %299 = vmatpush.msra.mxu3 %v147_v53  ;;  %v170_v13 = vld [vmem:[#allocation4 + $0x258] sm:$0xff]  ;;  %v187_v14 = vld [vmem:[#allocation4 + $0x2e0] sm:$0xff]  ;;  %v201_v16 = vld [vmem:[#allocation4 + $0x350] sm:$0xff] }
  0x2d   :  { %260 = vmatpush.msra.mxu1 %v114_v48  ;;  %281 = vmatpush.msra.mxu2 %v129_v50  ;;  %v218_v15 = vld [vmem:[#allocation4 + $0x3d8] sm:$0xff]  ;;  %v169_v17 = vld [vmem:[#allocation4 + $0x250] sm:$0xff]  ;;  %v200_v20 = vld [vmem:[#allocation4 + $0x348] sm:$0xff] }
  0x2e   :  { %241 = vmatpush.msra.mxu0 %v97_v51  ;;  %300 = vmatpush.msra.mxu3 %v146_v57  ;;  %v186_v18 = vld [vmem:[#allocation4 + $0x2d8] sm:$0xff]  ;;  %v217_v19 = vld [vmem:[#allocation4 + $0x3d0] sm:$0xff]  ;;  %v168_v21 = vld [vmem:[#allocation4 + $0x248] sm:$0xff] }
  0x2f   :  { %261 = vmatpush.msra.mxu1 %v113_v52  ;;  %282 = vmatpush.msra.mxu2 %v128_v54  ;;  %v185_v22 = vld [vmem:[#allocation4 + $0x2d0] sm:$0xff]  ;;  %v216_v23 = vld [vmem:[#allocation4 + $0x3c8] sm:$0xff]  ;;  %v199_v24 = vld [vmem:[#allocation4 + $0x340] sm:$0xff] }
  0x30   :  { %242 = vmatpush.msra.mxu0 %v96_v55  ;;  %301 = vmatpush.msra.mxu3 %v145_v63  ;;  %v167_v25 = vld [vmem:[#allocation4 + $0x240] sm:$0xff]  ;;  %v184_v26 = vld [vmem:[#allocation4 + $0x2c8] sm:$0xff]  ;;  %v198_v28 = vld [vmem:[#allocation4 + $0x338] sm:$0xff] }
  0x31   :  { %262 = vmatpush.msra.mxu1 %v112_v56  ;;  %283 = vmatpush.msra.mxu2 %v127_v58  ;;  %v215_v27 = vld [vmem:[#allocation4 + $0x3c0] sm:$0xff]  ;;  %v166_v29 = vld [vmem:[#allocation4 + $0x238] sm:$0xff]  ;;  %v197_v31 = vld [vmem:[#allocation4 + $0x330] sm:$0xff] }
  0x32   :  { %243 = vmatpush.msra.mxu0 %v95_v59  ;;  %302 = vmatpush.msra.mxu3 %v144_v3  ;;  %v183_v30 = vld [vmem:[#allocation4 + $0x2c0] sm:$0xff]  ;;  %v214_v32 = vld [vmem:[#allocation4 + $0x3b8] sm:$0xff]  ;;  %v165_v33 = vld [vmem:[#allocation4 + $0x230] sm:$0xff] }
  0x33   :  { %348 = vmatpush.msrb.mxu2 %v206_v60  ;;  %263 = vmatpush.msra.mxu1 %v111_v62  ;;  %v182_v34 = vld [vmem:[#allocation4 + $0x2b8] sm:$0xff]  ;;  %v213_v35 = vld [vmem:[#allocation4 + $0x3b0] sm:$0xff]  ;;  %v196_v36 = vld [vmem:[#allocation4 + $0x328] sm:$0xff] }
  0x34   :  { %308 = vmatpush.msrb.mxu0 %v174_v61  ;;  %303 = vmatpush.msra.mxu3 %v143_v7  ;;  %v164_v37 = vld [vmem:[#allocation4 + $0x228] sm:$0xff]  ;;  %v181_v38 = vld [vmem:[#allocation4 + $0x2b0] sm:$0xff]  ;;  %v195_v40 = vld [vmem:[#allocation4 + $0x320] sm:$0xff] }
  0x35   :  { %349 = vmatpush.msrb.mxu2 %v205_v0  ;;  %328 = vmatpush.msrb.mxu1 %v190_v2  ;;  %v212_v39 = vld [vmem:[#allocation4 + $0x3a8] sm:$0xff]  ;;  %v163_v41 = vld [vmem:[#allocation4 + $0x220] sm:$0xff]  ;;  %v89_v42 = vld [vmem:[#allocation2 + $0x10] sm:$0xff] }
  0x36   :  { %309 = vmatpush.msrb.mxu0 %v173_v1  ;;  %371 = vmatpush.msrb.mxu3 %v219_v11  ;;  %v180_v43 = vld [vmem:[#allocation4 + $0x2a8] sm:$0xff]  ;;  %v194_v44 = vld [vmem:[#allocation4 + $0x318] sm:$0xff]  ;;  %v211_v45 = vld [vmem:[#allocation4 + $0x3a0] sm:$0xff] }
  0x37   :  { %350 = vmatpush.msrb.mxu2 %v204_v4  ;;  %329 = vmatpush.msrb.mxu1 %v189_v6  ;;  %v87_v46 = vld [vmem:[#allocation2] sm:$0xff]  ;;  %v90_v47 = vld [vmem:[#allocation2 + $0x18] sm:$0xff]  ;;  %v193_v50 = vld [vmem:[#allocation4 + $0x310] sm:$0xff] }
  0x38   :  { %310 = vmatpush.msrb.mxu0 %v172_v5  ;;  %372 = vmatpush.msrb.mxu3 %v218_v15  ;;  %v162_v48 = vld [vmem:[#allocation4 + $0x218] sm:$0xff]  ;;  %v179_v49 = vld [vmem:[#allocation4 + $0x2a0] sm:$0xff]  ;;  %v88_v52 = vld [vmem:[#allocation2 + $0x8] sm:$0xff] }
  0x39   :  { %351 = vmatpush.msrb.mxu2 %v203_v8  ;;  %330 = vmatpush.msrb.mxu1 %v188_v10  ;;  %v210_v51 = vld [vmem:[#allocation4 + $0x398] sm:$0xff]  ;;  %v161_v53 = vld [vmem:[#allocation4 + $0x210] sm:$0xff]  ;;  %v192_v55 = vld [vmem:[#allocation4 + $0x308] sm:$0xff] }
  0x3a   :  { %311 = vmatpush.msrb.mxu0 %v171_v9  ;;  %373 = vmatpush.msrb.mxu3 %v217_v19  ;;  %v178_v54 = vld [vmem:[#allocation4 + $0x298] sm:$0xff]  ;;  %v209_v56 = vld [vmem:[#allocation4 + $0x390] sm:$0xff]  ;;  %v160_v57 = vld [vmem:[#allocation4 + $0x208] sm:$0xff] }
  0x3b   :  { %352 = vmatpush.msrb.mxu2 %v202_v12  ;;  %331 = vmatpush.msrb.mxu1 %v187_v14  ;;  %v177_v58 = vld [vmem:[#allocation4 + $0x290] sm:$0xff]  ;;  %v191_v59 = vld [vmem:[#allocation4 + $0x300] sm:$0xff]  ;;  %v208_v60 = vld [vmem:[#allocation4 + $0x388] sm:$0xff] }
  0x3c   :  { %312 = vmatpush.msrb.mxu0 %v170_v13  ;;  %374 = vmatpush.msrb.mxu3 %v216_v23  ;;  %v93_v61 = vld [vmem:[#allocation2 + $0x30] sm:$0xff]  ;;  %v159_v62 = vld [vmem:[#allocation4 + $0x200] sm:$0xff]  ;;  %v176_v63 = vld [vmem:[#allocation4 + $0x288] sm:$0xff] }
  0x3d   :  { %353 = vmatpush.msrb.mxu2 %v201_v16  ;;  %332 = vmatpush.msrb.mxu1 %v186_v18  ;;  %v207_v0 = vld [vmem:[#allocation4 + $0x380] sm:$0xff]  ;;  %v94_v2 = vld [vmem:[#allocation2 + $0x38] sm:$0xff]  ;;  %v92_v4 = vld [vmem:[#allocation2 + $0x28] sm:$0xff] }
  0x3e   :  { %313 = vmatpush.msrb.mxu0 %v169_v17  ;;  %375 = vmatpush.msrb.mxu3 %v215_v27  ;;  %v91_v1 = vld [vmem:[#allocation2 + $0x20] sm:$0xff]  ;;  %v403_v6 = vld [vmem:[#allocation6 + $0x70] sm:$0xff]  ;;  %v402_v7 = vld [vmem:[#allocation6 + $0x68] sm:$0xff] }
  0x3f   :  { %354 = vmatpush.msrb.mxu2 %v200_v20  ;;  %333 = vmatpush.msrb.mxu1 %v185_v22  ;;  %v175_v3 = vld [vmem:[#allocation4 + $0x280] sm:$0xff]  ;;  %v401_v8 = vld [vmem:[#allocation6 + $0x60] sm:$0xff]  ;;  %v399_v10 = vld [vmem:[#allocation6 + $0x50] sm:$0xff] }
  0x40   :  { %314 = vmatpush.msrb.mxu0 %v168_v21  ;;  %376 = vmatpush.msrb.mxu3 %v214_v32  ;;  %v404_v5 = vld [vmem:[#allocation6 + $0x78] sm:$0xff]  ;;  %v398_v11 = vld [vmem:[#allocation6 + $0x48] sm:$0xff]  ;;  %v397_v12 = vld [vmem:[#allocation6 + $0x40] sm:$0xff] }
  0x41   :  { %355 = vmatpush.msrb.mxu2 %v199_v24  ;;  %334 = vmatpush.msrb.mxu1 %v184_v26  ;;  %v400_v9 = vld [vmem:[#allocation6 + $0x58] sm:$0xff]  ;;  %v395_v14 = vld [vmem:[#allocation6 + $0x30] sm:$0xff]  ;;  %v394_v15 = vld [vmem:[#allocation6 + $0x28] sm:$0xff] }
  0x42   :  { %315 = vmatpush.msrb.mxu0 %v167_v25  ;;  %377 = vmatpush.msrb.mxu3 %v213_v35  ;;  %v396_v13 = vld [vmem:[#allocation6 + $0x38] sm:$0xff]  ;;  %v393_v16 = vld [vmem:[#allocation6 + $0x20] sm:$0xff]  ;;  %v391_v18 = vld [vmem:[#allocation6 + $0x10] sm:$0xff] }
  0x43   :  { %356 = vmatpush.msrb.mxu2 %v198_v28  ;;  %335 = vmatpush.msrb.mxu1 %v183_v30  ;;  %v392_v17 = vld [vmem:[#allocation6 + $0x18] sm:$0xff]  ;;  %v390_v19 = vld [vmem:[#allocation6 + $0x8] sm:$0xff]  ;;  %v389_v20 = vld [vmem:[#allocation6] sm:$0xff] }
  0x44   :  { %316 = vmatpush.msrb.mxu0 %v166_v29  ;;  %378 = vmatpush.msrb.mxu3 %v212_v39  ;;  %v445_v21 = vld [vmem:[#allocation7 + $0x78] sm:$0xff]  ;;  %v444_v22 = vld [vmem:[#allocation7 + $0x70] sm:$0xff]  ;;  %v443_v23 = vld [vmem:[#allocation7 + $0x68] sm:$0xff] }
  0x45   :  { %357 = vmatpush.msrb.mxu2 %v197_v31  ;;  %336 = vmatpush.msrb.mxu1 %v182_v34  ;;  %v442_v24 = vld [vmem:[#allocation7 + $0x60] sm:$0xff]  ;;  %v441_v25 = vld [vmem:[#allocation7 + $0x58] sm:$0xff]  ;;  %v440_v27 = vld [vmem:[#allocation7 + $0x50] sm:$0xff] }
  0x46   :  { %317 = vmatpush.msrb.mxu0 %v165_v33  ;;  %284 = vmatmul.f32.vlgmr.msra.gmra.mxu2 %v89_v42  ;;  %v486_v26 = vld [vmem:[%s663_s2] ss:$0 sm:$0xff]  ;;  %v439_v28 = vld [vmem:[#allocation7 + $0x48] sm:$0xff]  ;;  %v438_v31 = vld [vmem:[#allocation7 + $0x40] sm:$0xff] }
  0x47   :  { %358 = vmatpush.msrb.mxu2 %v196_v36  ;;  %337 = vmatpush.msrb.mxu1 %v181_v38  ;;  %v437_v33 = vld [vmem:[#allocation7 + $0x38] sm:$0xff]  ;;  %v436_v36 = vld [vmem:[#allocation7 + $0x30] sm:$0xff]  ;;  %v435_v39 = vld [vmem:[#allocation7 + $0x28] sm:$0xff] }
  0x48   :  { %318 = vmatpush.msrb.mxu0 %v164_v37  ;;  %379 = vmatpush.msrb.mxu3 %v211_v45  ;;  %v434_v42 = vld [vmem:[#allocation7 + $0x20] sm:$0xff]  ;;  %v433_v45 = vld [vmem:[#allocation7 + $0x18] sm:$0xff] }
  0x49   :  { %359 = vmatpush.msrb.mxu2 %v195_v40  ;;  %338 = vmatpush.msrb.mxu1 %v180_v43 }
  0x4a   :  { %319 = vmatpush.msrb.mxu0 %v163_v41  ;;  %304 = vmatmul.f32.vlgmr.msra.gmra.mxu3 %v90_v47 }
  0x4b   :  { %360 = vmatpush.msrb.mxu2 %v194_v44  ;;  %244 = vmatmul.f32.vlgmr.msra.gmra.mxu0 %v87_v46 }
  0x4c   :  { %320 = vmatpush.msrb.mxu0 %v162_v48  ;;  %339 = vmatpush.msrb.mxu1 %v179_v49 }
  0x4d   :  { %361 = vmatpush.msrb.mxu2 %v193_v50  ;;  %380 = vmatpush.msrb.mxu3 %v210_v51 }
  0x4e   :  { %264 = vmatmul.f32.vlgmr.msra.gmra.mxu1 %v88_v52  ;;  %321 = vmatpush.msrb.mxu0 %v161_v53  ;;  %v432_v52 = vld [vmem:[#allocation7 + $0x10] sm:$0xff]  ;;  %v431_v53 = vld [vmem:[#allocation7 + $0x8] sm:$0xff] }
  0x4f   :  { %340 = vmatpush.msrb.mxu1 %v178_v54  ;;  %362 = vmatpush.msrb.mxu2 %v192_v55  ;;  %v430_v54 = vld [vmem:[#allocation7] sm:$0xff]  ;;  %v487_v55 = vld [vmem:[%s665_s4] ss:$0 sm:$0xff] }
  0x50   :  { %381 = vmatpush.msrb.mxu3 %v209_v56  ;;  %322 = vmatpush.msrb.mxu0 %v160_v57 }
  0x51   :  { %341 = vmatpush.msrb.mxu1 %v177_v58  ;;  %363 = vmatpush.msrb.mxu2 %v191_v59  ;;  %v488_v59 = vld [vmem:[%s667_s6] ss:$0 sm:$0xff] }
  0x52   :  { %382 = vmatpush.msrb.mxu3 %v208_v60  ;;  %364 = vmatmul.f32.vlgmr.msrb.gmra.mxu2 %v93_v61 }
  0x53   :  { %323 = vmatpush.msrb.mxu0 %v159_v62  ;;  %342 = vmatpush.msrb.mxu1 %v176_v63 }
  0x54   :  { %383 = vmatpush.msrb.mxu3 %v207_v0  ;;  %324 = vmatmul.f32.vlgmr.msrb.gmra.mxu0 %v91_v1 }
  0x55   :  { %479 = vmatmul.msk.f32.vlgmr.msrb.gmra.mxu3 %vm224_vm0, %v94_v2  ;;  %343 = vmatpush.msrb.mxu1 %v175_v3 }
  0x56   :  { %344 = vmatmul.f32.vlgmr.msrb.gmra.mxu1 %v92_v4  ;;  %409 = vmatpush.msra.mxu3 %v404_v5 }
  0x57   :  { %450 = vmatpush.msra.mxu0 %v445_v21 }
  0x58   :  { %410 = vmatpush.msra.mxu3 %v403_v6 }
  0x59   :  { %451 = vmatpush.msra.mxu0 %v444_v22 }
  0x5a   :  { %411 = vmatpush.msra.mxu3 %v402_v7 }
  0x5b   :  { %452 = vmatpush.msra.mxu0 %v443_v23 }
  0x5c   :  { %412 = vmatpush.msra.mxu3 %v401_v8 }
  0x5d   :  { %453 = vmatpush.msra.mxu0 %v442_v24 }
  0x5e   :  { %413 = vmatpush.msra.mxu3 %v400_v9 }
  0x5f   :  { %454 = vmatpush.msra.mxu0 %v441_v25 }
  0x60   :  { %414 = vmatpush.msra.mxu3 %v399_v10 }
  0x61   :  { %455 = vmatpush.msra.mxu0 %v440_v27 }
  0x62   :  { %415 = vmatpush.msra.mxu3 %v398_v11 }
  0x63   :  { %456 = vmatpush.msra.mxu0 %v439_v28 }
  0x64   :  { %416 = vmatpush.msra.mxu3 %v397_v12 }
  0x65   :  { %457 = vmatpush.msra.mxu0 %v438_v31 }
  0x66   :  { %417 = vmatpush.msra.mxu3 %v396_v13 }
  0x67   :  { %458 = vmatpush.msra.mxu0 %v437_v33 }
  0x68   :  { %418 = vmatpush.msra.mxu3 %v395_v14 }
  0x69   :  { %459 = vmatpush.msra.mxu0 %v436_v36 }
  0x6a   :  { %419 = vmatpush.msra.mxu3 %v394_v15 }
  0x6b   :  { %460 = vmatpush.msra.mxu0 %v435_v39 }
  0x6c   :  { %420 = vmatpush.msra.mxu3 %v393_v16 }
  0x6d   :  { %461 = vmatpush.msra.mxu0 %v434_v42 }
  0x6e   :  { %421 = vmatpush.msra.mxu3 %v392_v17 }
  0x6f   :  { %462 = vmatpush.msra.mxu0 %v433_v45 }
  0x70   :  { %422 = vmatpush.msra.mxu3 %v391_v18 }
  0x71   :  { %463 = vmatpush.msra.mxu0 %v432_v52 }
  0x72   :  { %423 = vmatpush.msra.mxu3 %v390_v19 }
  0x73   :  { %464 = vmatpush.msra.mxu0 %v431_v53 }
  0x74   :  { %424 = vmatpush.msra.mxu3 %v389_v20 }
  0x75   :  { %465 = vmatpush.msra.mxu0 %v430_v54 }
  0xc8   :  { %v245_v29 = vpop.f32.mrf.mxu0 }
  0xc9   :  { %v246_v30 = vadd.f32 %v486_v26, %v245_v29  ;;  %v285_v35 = vpop.f32.mrf.mxu2 }
  0xcb   :  { %v265_v32 = vpop.f32.mrf.mxu1 }
  0xcc   :  { %v266_v34 = vadd.f32 %v265_v32, %v246_v30 }
  0xcd   :  { %v305_v38 = vpop.f32.mrf.mxu3 }
  0xce   :  { %v286_v37 = vadd.f32 %v285_v35, %v266_v34 }
  0xd0   :  { %v306_v40 = vadd.f32 %v305_v38, %v286_v37 }
  0xd1   :  { %v325_v41 = vpop.f32.mrf.mxu0 }
  0xd2   :  { %v326_v43 = vadd.f32 %v325_v41, %v306_v40 }
  0xd3   :  { %v345_v44 = vpop.f32.mrf.mxu1 }
  0xd4   :  { %v346_v46 = vadd.f32 %v345_v44, %v326_v43 }
  0xd5   :  { %v365_v47 = vpop.f32.mrf.mxu2 }
  0xd6   :  { %v366_v48 = vadd.f32 %v365_v47, %v346_v46 }
  0xd8   :  { %v385_v49 = vpop.f32.mrf.mxu3 }
  0xd9   :  { %v386_v50 = vadd.f32 %v385_v49, %v366_v48 }
  0xdb   :  { %v388_v51 = vmax.f32 %v386_v50, 0.0 }
  0xdd   :  { %425 = vmatmul.f32.vlgmr.msra.gmra.mxu3 %v388_v51 }
 0x160   :  { %v426_v56 = vpop.f32.mrf.mxu3 }
 0x161   :  { %v427_v57 = vadd.f32 %v487_v55, %v426_v56 }
 0x163   :  { %v429_v58 = vmax.f32 %v427_v57, 0.0 }
 0x165   :  { %466 = vmatmul.f32.vlgmr.msra.gmra.mxu0 %v429_v58 }
 0x1e2   :  { %v467_v60 = vpop.f32.mrf.mxu0 }
 0x1e3   :  { %v468_v61 = vadd.f32 %v488_v59, %v467_v60 }
 0x1e5   :  { %471 = vst.msk [vmem:[%s668_s7] sm:$0xff] %vm470_vm1, %v468_v61 }
 0x1e6   :  { %476 = vsyncpa [#allocation3], 1 }
 0x1e7   :  { %477 = vsyncpa [#allocation5], 1 }
 0x1e8   :  { %478 = vsyncpa [#allocation8], 1 }

</bundles_post_ra>
